<compile_context>
chip_gen: v6e
topology: v6e:2x2x1
jax: 0.10.0
libtpu: 0.0.40
codegen_flags: <defaults>
</compile_context>

<pallas_src>
import functools
import math

import numpy as np
import jax
import jax.numpy as jnp
from jax.experimental import pallas as pl
from jax.experimental.pallas import tpu as pltpu


# ----------------------------------------------------------------------------------
# Fused conv stack: n_layers x [Conv1d(k, pad, no bias) + BatchNorm(eval, folded) + ReLU]
# Activations are flattened time-major (T*B, C): row r = t*B + b.  All layers run inside a
# single kernel so intermediates never touch HBM.
# ----------------------------------------------------------------------------------
def _conv_stack_kernel(*refs, B, K, n_layers, compute_dtype):
    x_ref = refs[0]
    o_ref = refs[1 + 2 * n_layers]
    pad = (K - 1) // 2
    TB = x_ref.shape[0]

    a = x_ref[...]                                          # (T*B, Cin) f32
    for layer in range(n_layers):
        w_ref = refs[1 + 2 * layer]                         # (K, Cin, Cout), BN scale folded in
        b_ref = refs[2 + 2 * layer]                         # (1, Cout)      folded BN bias
        cin = a.shape[1]
        cout = w_ref.shape[2]
        a_c = a.astype(compute_dtype)
        zpad = jnp.zeros((pad * B, cin), compute_dtype)
        a_pad = jnp.concatenate([zpad, a_c, zpad], axis=0)  # in-kernel halo, no HBM pad copy
        acc = jnp.zeros((TB, cout), jnp.float32)
        for k in range(K):                                  # K tall matmuls, M = T*B
            acc += jnp.dot(a_pad[k * B:k * B + TB, :],
                           w_ref[k].astype(compute_dtype),
                           preferred_element_type=jnp.float32)
        a = jnp.maximum(acc + b_ref[...], 0.0)              # BN bias + ReLU (Dropout eval = id)
    o_ref[...] = a.astype(o_ref.dtype)


def conv_stack(x2d, conv_params, *, B, compute_dtype):
    n_layers = len(conv_params)
    K = conv_params[0][0].shape[0]
    cout = conv_params[-1][0].shape[2]
    args = [x2d]
    for w, b in conv_params:
        args += [w, b]
    kernel = functools.partial(_conv_stack_kernel, B=B, K=K,
                               n_layers=n_layers, compute_dtype=compute_dtype)
    return pl.pallas_call(
        kernel,
        out_shape=jax.ShapeDtypeStruct((x2d.shape[0], cout), jnp.float32),
        in_specs=[pl.BlockSpec(memory_space=pltpu.MemorySpace.VMEM)] * len(args),
        out_specs=pl.BlockSpec(memory_space=pltpu.MemorySpace.VMEM),
    )(*args)


# ----------------------------------------------------------------------------------
# Fused bidirectional LSTM with packed-sequence masking.
# Grid = (direction, time-chunk): direction is "parallel" (one per TC on v7x), chunks are
# "arbitrary" with (h, c) carried across chunks in VMEM scratch.  X @ Wih is hoisted out of
# the recurrence as one MXU matmul per chunk; only h @ Whh stays in the serial loop (f32).
# ----------------------------------------------------------------------------------
def _blstm_kernel(x_ref, wih_ref, whh_ref, b_ref, ilens_ref, o_ref,
                  gx_sc, h_sc, c_sc, *, H, Tc, B, compute_dtype):
    d = pl.program_id(0)              # 0 = forward, 1 = backward
    c = pl.program_id(1)              # chunk counter for this direction
    nc = pl.num_programs(1)

    @pl.when(c == 0)                  # first chunk of each direction: reset recurrent state
    def _():
        h_sc[...] = jnp.zeros_like(h_sc)
        c_sc[...] = jnp.zeros_like(c_sc)

    # hoisted input projection: one (Tc*B, C) x (C, 4H) MXU matmul per chunk (bf16 in, f32 acc)
    gx_sc[...] = (jnp.dot(x_ref[...].astype(compute_dtype),
                          wih_ref[...].astype(compute_dtype),
                          preferred_element_type=jnp.float32) + b_ref[...])

    whh = whh_ref[...]                # (H, 4H) — keep the recurrent matmul in f32
    ilens = ilens_ref[...]            # (B, 1) int32
    chunk = c + d * (nc - 1 - 2 * c)  # backward direction walks chunks in reverse
    t0 = chunk * Tc

    @pl.loop(0, Tc)
    def _(s):
        tt = s + d * (Tc - 1 - 2 * s)             # in-chunk step (reversed for backward)
        valid = (t0 + tt) < ilens                 # (B, 1) packed-sequence mask
        gates = (gx_sc[pl.ds(tt * B, B), :]
                 + jnp.dot(h_sc[...], whh, preferred_element_type=jnp.float32))   # (B, 4H)
        act = jax.nn.sigmoid(gates)               # one EUP pass for i, f, o (torch gate order)
        i_g = act[:, 0:H]
        f_g = act[:, H:2 * H]
        o_g = act[:, 3 * H:4 * H]
        g_g = jnp.tanh(gates[:, 2 * H:3 * H])
        c_old = c_sc[...]
        c_new = f_g * c_old + i_g * g_g
        h_new = o_g * jnp.tanh(c_new)
        # packed-sequence semantics: state frozen and output zeroed for t >= ilen[b]
        h_sc[...] = jnp.where(valid, h_new, h_sc[...])
        c_sc[...] = jnp.where(valid, c_new, c_old)
        o_ref[tt] = jnp.where(valid, h_new, 0.0).astype(o_ref.dtype)


def blstm(x2d, ilens_b1, wih, whh, bias, *, T_pad, B, Tc, compute_dtype):
    C = x2d.shape[1]
    H = whh.shape[1]
    NC = T_pad // Tc

    def chunk_idx(d, c):              # block index of the time chunk handled at grid step (d, c)
        return c + d * (NC - 1 - 2 * c)

    kernel = functools.partial(_blstm_kernel, H=H, Tc=Tc, B=B, compute_dtype=compute_dtype)
    return pl.pallas_call(
        kernel,
        out_shape=jax.ShapeDtypeStruct((2, T_pad, B, H), jnp.float32),
        grid=(2, NC),
        in_specs=[
            pl.BlockSpec((Tc * B, C), lambda d, c: (chunk_idx(d, c), 0)),
            pl.BlockSpec((None, C, 4 * H), lambda d, c: (d, 0, 0)),
            pl.BlockSpec((None, H, 4 * H), lambda d, c: (d, 0, 0)),
            pl.BlockSpec((None, 1, 4 * H), lambda d, c: (d, 0, 0)),
            pl.BlockSpec((B, 1), lambda d, c: (0, 0)),
        ],
        out_specs=pl.BlockSpec((None, Tc, B, H),
                               lambda d, c: (d, chunk_idx(d, c), 0, 0)),
        scratch_shapes=[pltpu.VMEM((Tc * B, 4 * H), jnp.float32),   # per-chunk gates_x slab
                        pltpu.VMEM((B, H), jnp.float32),            # h carry
                        pltpu.VMEM((B, H), jnp.float32)],           # c carry
        compiler_params=pltpu.CompilerParams(
            dimension_semantics=("parallel", "arbitrary")),
    )(x2d, wih, whh, bias, ilens_b1)


def _pick_time_chunk(T, B, hint):
    step = 8 // math.gcd(B, 8)                        # smallest Tc with (Tc * B) % 8 == 0 (f32)
    Tc = max(step, (max(hint, step) // step) * step)
    Tc = min(Tc, ((T + step - 1) // step) * step)     # never bigger than the padded sequence
    T_pad = ((T + Tc - 1) // Tc) * Tc
    return Tc, T_pad


# ---------------- parameter construction (deterministic, matches __init__ shapes) -----
def init_params(key, idim, econv_chans, econv_layers, econv_filts, eunits):
    eps = 1e-5
    params = {"convs": []}
    keys = jax.random.split(key, econv_layers + 1)
    gain = float(np.sqrt(2.0))                        # torch.nn.init.calculate_gain('relu')
    for layer in range(econv_layers):
        ichans = idim if layer == 0 else econv_chans
        fan_in = ichans * econv_filts
        fan_out = econv_chans * econv_filts
        bound = gain * float(np.sqrt(6.0 / (fan_in + fan_out)))      # xavier_uniform_
        w = jax.random.uniform(keys[layer], (econv_chans, ichans, econv_filts),
                               jnp.float32, -bound, bound)           # (Cout, Cin, K) torch layout
        # BatchNorm1d eval with defaults: gamma=1, beta=0, running_mean=0, running_var=1
        scale = jnp.ones((econv_chans,), jnp.float32) / jnp.sqrt(1.0 + eps)
        beta = jnp.zeros((econv_chans,), jnp.float32)
        w_folded = jnp.transpose(w, (2, 1, 0)) * scale[None, None, :]    # (K, Cin, Cout)
        params["convs"].append((w_folded, beta[None, :]))

    H = eunits // 2
    C = econv_chans
    kk = 1.0 / float(np.sqrt(H))
    ks = jax.random.split(keys[econv_layers], 8)

    def u(k, shape):
        return jax.random.uniform(k, shape, jnp.float32, -kk, kk)

    # torch LSTM per direction: weight_ih (4H, C), weight_hh (4H, H), bias = b_ih + b_hh
    params["wih"] = jnp.stack([u(ks[0], (4 * H, C)).T, u(ks[4], (4 * H, C)).T])       # (2, C, 4H)
    params["whh"] = jnp.stack([u(ks[1], (4 * H, H)).T, u(ks[5], (4 * H, H)).T])       # (2, H, 4H)
    params["b"] = jnp.stack([(u(ks[2], (4 * H,)) + u(ks[3], (4 * H,)))[None, :],
                             (u(ks[6], (4 * H,)) + u(ks[7], (4 * H,)))[None, :]])     # (2, 1, 4H)
    return params


# ---------------- full forward (thin glue in JAX, hot path in two Pallas kernels) ------
def content_encoder_forward(xs, ilens, params, *, compute_dtype=jnp.bfloat16, time_chunk=64):
    B, T, idim = xs.shape
    # flatten once to time-major (t, b) rows; this replaces torch's xs.transpose(1, 2) and is the
    # only wrapper relayout of the (small, idim-wide) input.
    x2d = jnp.transpose(xs, (1, 0, 2)).reshape(T * B, idim)
    h2d = conv_stack(x2d, params["convs"], B=B, compute_dtype=compute_dtype)      # (T*B, C)

    Tc, T_pad = _pick_time_chunk(T, B, time_chunk)
    if T_pad != T:
        h2d = jnp.pad(h2d, ((0, (T_pad - T) * B), (0, 0)))
    ilens_b1 = ilens.astype(jnp.int32)[:, None]
    o = blstm(h2d, ilens_b1, params["wih"], params["whh"], params["b"],
              T_pad=T_pad, B=B, Tc=Tc, compute_dtype=compute_dtype)               # (2, T_pad, B, H)

    # (2, T, B, H) -> (B, T, 2H): [forward | backward] on the feature axis, like torch BLSTM.
    out = jnp.transpose(o, (2, 1, 0, 3)).reshape(B, T_pad, -1)
    tmax = int(np.max(np.asarray(ilens)))     # pad_packed_sequence trims to max length (host-side)
    return out[:, :tmax, :], ilens


# ---------------- pure-JAX reference (same math / same bf16 casts) for self-check ------
def ref_forward(xs, ilens, params, compute_dtype=jnp.bfloat16):
    B, T, _ = xs.shape
    h = xs
    for w, bias in params["convs"]:                   # w: (K, Cin, Cout)
        K, _, cout = w.shape
        pad = (K - 1) // 2
        hp = jnp.pad(h, ((0, 0), (pad, pad), (0, 0)))
        acc = jnp.zeros((B, T, cout), jnp.float32)
        for k in range(K):
            acc = acc + jnp.dot(hp[:, k:k + T, :].astype(compute_dtype),
                                w[k].astype(compute_dtype),
                                preferred_element_type=jnp.float32)
        h = jnp.maximum(acc + bias[None], 0.0)

    H = params["whh"].shape[1]

    def run_dir(d, reverse):
        wih, whh, b = params["wih"][d], params["whh"][d], params["b"][d]
        gx = jnp.dot(h.astype(compute_dtype), wih.astype(compute_dtype),
                     preferred_element_type=jnp.float32) + b          # (B, T, 4H)

        def step(carry, t):
            hh, cc = carry
            gates = gx[:, t, :] + hh @ whh
            i = jax.nn.sigmoid(gates[:, :H])
            f = jax.nn.sigmoid(gates[:, H:2 * H])
            g = jnp.tanh(gates[:, 2 * H:3 * H])
            o = jax.nn.sigmoid(gates[:, 3 * H:])
            c_new = f * cc + i * g
            h_new = o * jnp.tanh(c_new)
            valid = (t < ilens)[:, None]
            hh = jnp.where(valid, h_new, hh)
            cc = jnp.where(valid, c_new, cc)
            return (hh, cc), jnp.where(valid, h_new, 0.0)

        ts = jnp.arange(T - 1, -1, -1) if reverse else jnp.arange(T)
        init = (jnp.zeros((B, H), jnp.float32), jnp.zeros((B, H), jnp.float32))
        _, outs = jax.lax.scan(step, init, ts)
        out_t = jnp.zeros((T, B, H), jnp.float32).at[ts].set(outs)
        return jnp.transpose(out_t, (1, 0, 2))

    out = jnp.concatenate([run_dir(0, False), run_dir(1, True)], axis=-1)
    return out[:, :int(np.max(np.asarray(ilens))), :]


if __name__ == "__main__":
    B, T, idim = 2, 8, 8
    econv_chans, econv_layers, econv_filts = 32, 3, 5
    eunits = 32

    key = jax.random.PRNGKey(0)
    k_x, k_p = jax.random.split(key)
    xs = jax.random.normal(k_x, (B, T, idim), jnp.float32)
    ilens = jnp.array([8, 6], jnp.int32)
    # "Padded value should be 0" per the docstring.
    tmask = (jnp.arange(T)[None, :] < ilens[:, None]).astype(jnp.float32)
    xs = xs * tmask[:, :, None]

    params = init_params(k_p, idim, econv_chans, econv_layers, econv_filts, eunits)

    # time_chunk=4 -> two chunks, exercising the chunked carry + reversed backward sweep.
    out, hlens = content_encoder_forward(xs, ilens, params,
                                         compute_dtype=jnp.bfloat16, time_chunk=4)
    out = jax.block_until_ready(out)

    ref = ref_forward(xs, ilens, params, compute_dtype=jnp.bfloat16)
    np.testing.assert_allclose(np.asarray(out), np.asarray(ref), rtol=5e-3, atol=5e-3)
    assert out.shape == (B, int(np.max(np.asarray(ilens))), eunits)
    print("KERNEL_OK")
</pallas_src>

<mosaic_0001>
module attributes {stable_mosaic.version = 11 : i64} {
  func.func @_conv_stack_kernel(%arg0: memref<16x8xf32, #tpu.memory_space<vmem>>, %arg1: memref<5x8x32xf32, #tpu.memory_space<vmem>>, %arg2: memref<1x32xf32, #tpu.memory_space<vmem>>, %arg3: memref<5x32x32xf32, #tpu.memory_space<vmem>>, %arg4: memref<1x32xf32, #tpu.memory_space<vmem>>, %arg5: memref<5x32x32xf32, #tpu.memory_space<vmem>>, %arg6: memref<1x32xf32, #tpu.memory_space<vmem>>, %arg7: memref<16x32xf32, #tpu.memory_space<vmem>>) attributes {dimension_semantics = [], scalar_prefetch = 0 : i64, scratch_operands = 0 : i64, tpu.core_type = #tpu.core_type<tc>} {
    %c0 = arith.constant 0 : index
    %c0_0 = arith.constant 0 : index
    %0 = vector.load %arg0[%c0, %c0_0] : memref<16x8xf32, #tpu.memory_space<vmem>>, vector<16x8xf32>
    %1 = arith.truncf %0 : vector<16x8xf32> to vector<16x8xbf16>
    %cst = arith.constant 0.000000e+00 : bf16
    %2 = vector.broadcast %cst : bf16 to vector<4x8xbf16>
    %3 = tpu.concatenate %2, %1, %2 in 0 : vector<4x8xbf16>, vector<16x8xbf16>, vector<4x8xbf16> -> vector<24x8xbf16>
    %cst_1 = arith.constant 0.000000e+00 : f32
    %4 = vector.broadcast %cst_1 : f32 to vector<16x32xf32>
    %5 = vector.extract_strided_slice %3 {offsets = [0, 0], sizes = [16, 8], strides = [1, 1]} : vector<24x8xbf16> to vector<16x8xbf16>
    %c0_2 = arith.constant 0 : index
    %c0_3 = arith.constant 0 : index
    %c0_4 = arith.constant 0 : index
    %6 = vector.load %arg1[%c0_2, %c0_3, %c0_4] : memref<5x8x32xf32, #tpu.memory_space<vmem>>, vector<1x8x32xf32>
    %7 = vector.shape_cast %6 : vector<1x8x32xf32> to vector<8x32xf32>
    %8 = arith.truncf %7 : vector<8x32xf32> to vector<8x32xbf16>
    %cst_5 = arith.constant dense<0.000000e+00> : vector<16x32xf32>
    %9 = tpu.matmul %5, %8, %cst_5 {dimension_numbers = #tpu.dot_dimension_numbers<[1], [0], [0], [1], [0, 0, 1, 1], [], []>} : vector<16x8xbf16>, vector<8x32xbf16>, vector<16x32xf32> -> vector<16x32xf32>
    %10 = arith.addf %4, %9 : vector<16x32xf32>
    %11 = vector.extract_strided_slice %3 {offsets = [2, 0], sizes = [16, 8], strides = [1, 1]} : vector<24x8xbf16> to vector<16x8xbf16>
    %c1 = arith.constant 1 : index
    %c0_6 = arith.constant 0 : index
    %c0_7 = arith.constant 0 : index
    %12 = vector.load %arg1[%c1, %c0_6, %c0_7] : memref<5x8x32xf32, #tpu.memory_space<vmem>>, vector<1x8x32xf32>
    %13 = vector.shape_cast %12 : vector<1x8x32xf32> to vector<8x32xf32>
    %14 = arith.truncf %13 : vector<8x32xf32> to vector<8x32xbf16>
    %cst_8 = arith.constant dense<0.000000e+00> : vector<16x32xf32>
    %15 = tpu.matmul %11, %14, %cst_8 {dimension_numbers = #tpu.dot_dimension_numbers<[1], [0], [0], [1], [0, 0, 1, 1], [], []>} : vector<16x8xbf16>, vector<8x32xbf16>, vector<16x32xf32> -> vector<16x32xf32>
    %16 = arith.addf %10, %15 : vector<16x32xf32>
    %17 = vector.extract_strided_slice %3 {offsets = [4, 0], sizes = [16, 8], strides = [1, 1]} : vector<24x8xbf16> to vector<16x8xbf16>
    %c2 = arith.constant 2 : index
    %c0_9 = arith.constant 0 : index
    %c0_10 = arith.constant 0 : index
    %18 = vector.load %arg1[%c2, %c0_9, %c0_10] : memref<5x8x32xf32, #tpu.memory_space<vmem>>, vector<1x8x32xf32>
    %19 = vector.shape_cast %18 : vector<1x8x32xf32> to vector<8x32xf32>
    %20 = arith.truncf %19 : vector<8x32xf32> to vector<8x32xbf16>
    %cst_11 = arith.constant dense<0.000000e+00> : vector<16x32xf32>
    %21 = tpu.matmul %17, %20, %cst_11 {dimension_numbers = #tpu.dot_dimension_numbers<[1], [0], [0], [1], [0, 0, 1, 1], [], []>} : vector<16x8xbf16>, vector<8x32xbf16>, vector<16x32xf32> -> vector<16x32xf32>
    %22 = arith.addf %16, %21 : vector<16x32xf32>
    %23 = vector.extract_strided_slice %3 {offsets = [6, 0], sizes = [16, 8], strides = [1, 1]} : vector<24x8xbf16> to vector<16x8xbf16>
    %c3 = arith.constant 3 : index
    %c0_12 = arith.constant 0 : index
    %c0_13 = arith.constant 0 : index
    %24 = vector.load %arg1[%c3, %c0_12, %c0_13] : memref<5x8x32xf32, #tpu.memory_space<vmem>>, vector<1x8x32xf32>
    %25 = vector.shape_cast %24 : vector<1x8x32xf32> to vector<8x32xf32>
    %26 = arith.truncf %25 : vector<8x32xf32> to vector<8x32xbf16>
    %cst_14 = arith.constant dense<0.000000e+00> : vector<16x32xf32>
    %27 = tpu.matmul %23, %26, %cst_14 {dimension_numbers = #tpu.dot_dimension_numbers<[1], [0], [0], [1], [0, 0, 1, 1], [], []>} : vector<16x8xbf16>, vector<8x32xbf16>, vector<16x32xf32> -> vector<16x32xf32>
    %28 = arith.addf %22, %27 : vector<16x32xf32>
    %29 = vector.extract_strided_slice %3 {offsets = [8, 0], sizes = [16, 8], strides = [1, 1]} : vector<24x8xbf16> to vector<16x8xbf16>
    %c4 = arith.constant 4 : index
    %c0_15 = arith.constant 0 : index
    %c0_16 = arith.constant 0 : index
    %30 = vector.load %arg1[%c4, %c0_15, %c0_16] : memref<5x8x32xf32, #tpu.memory_space<vmem>>, vector<1x8x32xf32>
    %31 = vector.shape_cast %30 : vector<1x8x32xf32> to vector<8x32xf32>
    %32 = arith.truncf %31 : vector<8x32xf32> to vector<8x32xbf16>
    %cst_17 = arith.constant dense<0.000000e+00> : vector<16x32xf32>
    %33 = tpu.matmul %29, %32, %cst_17 {dimension_numbers = #tpu.dot_dimension_numbers<[1], [0], [0], [1], [0, 0, 1, 1], [], []>} : vector<16x8xbf16>, vector<8x32xbf16>, vector<16x32xf32> -> vector<16x32xf32>
    %34 = arith.addf %28, %33 : vector<16x32xf32>
    %c0_18 = arith.constant 0 : index
    %c0_19 = arith.constant 0 : index
    %35 = vector.load %arg2[%c0_18, %c0_19] : memref<1x32xf32, #tpu.memory_space<vmem>>, vector<1x32xf32>
    %36 = vector.broadcast %35 : vector<1x32xf32> to vector<16x32xf32>
    %37 = arith.addf %34, %36 : vector<16x32xf32>
    %cst_20 = arith.constant 0.000000e+00 : f32
    %38 = vector.broadcast %cst_20 : f32 to vector<16x32xf32>
    %39 = arith.maximumf %37, %38 : vector<16x32xf32>
    %40 = arith.truncf %39 : vector<16x32xf32> to vector<16x32xbf16>
    %cst_21 = arith.constant 0.000000e+00 : bf16
    %41 = vector.broadcast %cst_21 : bf16 to vector<4x32xbf16>
    %42 = tpu.concatenate %41, %40, %41 in 0 : vector<4x32xbf16>, vector<16x32xbf16>, vector<4x32xbf16> -> vector<24x32xbf16>
    %cst_22 = arith.constant 0.000000e+00 : f32
    %43 = vector.broadcast %cst_22 : f32 to vector<16x32xf32>
    %44 = vector.extract_strided_slice %42 {offsets = [0, 0], sizes = [16, 32], strides = [1, 1]} : vector<24x32xbf16> to vector<16x32xbf16>
    %c0_23 = arith.constant 0 : index
    %c0_24 = arith.constant 0 : index
    %c0_25 = arith.constant 0 : index
    %45 = vector.load %arg3[%c0_23, %c0_24, %c0_25] : memref<5x32x32xf32, #tpu.memory_space<vmem>>, vector<1x32x32xf32>
    %46 = vector.shape_cast %45 : vector<1x32x32xf32> to vector<32x32xf32>
    %47 = arith.truncf %46 : vector<32x32xf32> to vector<32x32xbf16>
    %cst_26 = arith.constant dense<0.000000e+00> : vector<16x32xf32>
    %48 = tpu.matmul %44, %47, %cst_26 {dimension_numbers = #tpu.dot_dimension_numbers<[1], [0], [0], [1], [0, 0, 1, 1], [], []>} : vector<16x32xbf16>, vector<32x32xbf16>, vector<16x32xf32> -> vector<16x32xf32>
    %49 = arith.addf %43, %48 : vector<16x32xf32>
    %50 = vector.extract_strided_slice %42 {offsets = [2, 0], sizes = [16, 32], strides = [1, 1]} : vector<24x32xbf16> to vector<16x32xbf16>
    %c1_27 = arith.constant 1 : index
    %c0_28 = arith.constant 0 : index
    %c0_29 = arith.constant 0 : index
    %51 = vector.load %arg3[%c1_27, %c0_28, %c0_29] : memref<5x32x32xf32, #tpu.memory_space<vmem>>, vector<1x32x32xf32>
    %52 = vector.shape_cast %51 : vector<1x32x32xf32> to vector<32x32xf32>
    %53 = arith.truncf %52 : vector<32x32xf32> to vector<32x32xbf16>
    %cst_30 = arith.constant dense<0.000000e+00> : vector<16x32xf32>
    %54 = tpu.matmul %50, %53, %cst_30 {dimension_numbers = #tpu.dot_dimension_numbers<[1], [0], [0], [1], [0, 0, 1, 1], [], []>} : vector<16x32xbf16>, vector<32x32xbf16>, vector<16x32xf32> -> vector<16x32xf32>
    %55 = arith.addf %49, %54 : vector<16x32xf32>
    %56 = vector.extract_strided_slice %42 {offsets = [4, 0], sizes = [16, 32], strides = [1, 1]} : vector<24x32xbf16> to vector<16x32xbf16>
    %c2_31 = arith.constant 2 : index
    %c0_32 = arith.constant 0 : index
    %c0_33 = arith.constant 0 : index
    %57 = vector.load %arg3[%c2_31, %c0_32, %c0_33] : memref<5x32x32xf32, #tpu.memory_space<vmem>>, vector<1x32x32xf32>
    %58 = vector.shape_cast %57 : vector<1x32x32xf32> to vector<32x32xf32>
    %59 = arith.truncf %58 : vector<32x32xf32> to vector<32x32xbf16>
    %cst_34 = arith.constant dense<0.000000e+00> : vector<16x32xf32>
    %60 = tpu.matmul %56, %59, %cst_34 {dimension_numbers = #tpu.dot_dimension_numbers<[1], [0], [0], [1], [0, 0, 1, 1], [], []>} : vector<16x32xbf16>, vector<32x32xbf16>, vector<16x32xf32> -> vector<16x32xf32>
    %61 = arith.addf %55, %60 : vector<16x32xf32>
    %62 = vector.extract_strided_slice %42 {offsets = [6, 0], sizes = [16, 32], strides = [1, 1]} : vector<24x32xbf16> to vector<16x32xbf16>
    %c3_35 = arith.constant 3 : index
    %c0_36 = arith.constant 0 : index
    %c0_37 = arith.constant 0 : index
    %63 = vector.load %arg3[%c3_35, %c0_36, %c0_37] : memref<5x32x32xf32, #tpu.memory_space<vmem>>, vector<1x32x32xf32>
    %64 = vector.shape_cast %63 : vector<1x32x32xf32> to vector<32x32xf32>
    %65 = arith.truncf %64 : vector<32x32xf32> to vector<32x32xbf16>
    %cst_38 = arith.constant dense<0.000000e+00> : vector<16x32xf32>
    %66 = tpu.matmul %62, %65, %cst_38 {dimension_numbers = #tpu.dot_dimension_numbers<[1], [0], [0], [1], [0, 0, 1, 1], [], []>} : vector<16x32xbf16>, vector<32x32xbf16>, vector<16x32xf32> -> vector<16x32xf32>
    %67 = arith.addf %61, %66 : vector<16x32xf32>
    %68 = vector.extract_strided_slice %42 {offsets = [8, 0], sizes = [16, 32], strides = [1, 1]} : vector<24x32xbf16> to vector<16x32xbf16>
    %c4_39 = arith.constant 4 : index
    %c0_40 = arith.constant 0 : index
    %c0_41 = arith.constant 0 : index
    %69 = vector.load %arg3[%c4_39, %c0_40, %c0_41] : memref<5x32x32xf32, #tpu.memory_space<vmem>>, vector<1x32x32xf32>
    %70 = vector.shape_cast %69 : vector<1x32x32xf32> to vector<32x32xf32>
    %71 = arith.truncf %70 : vector<32x32xf32> to vector<32x32xbf16>
    %cst_42 = arith.constant dense<0.000000e+00> : vector<16x32xf32>
    %72 = tpu.matmul %68, %71, %cst_42 {dimension_numbers = #tpu.dot_dimension_numbers<[1], [0], [0], [1], [0, 0, 1, 1], [], []>} : vector<16x32xbf16>, vector<32x32xbf16>, vector<16x32xf32> -> vector<16x32xf32>
    %73 = arith.addf %67, %72 : vector<16x32xf32>
    %c0_43 = arith.constant 0 : index
    %c0_44 = arith.constant 0 : index
    %74 = vector.load %arg4[%c0_43, %c0_44] : memref<1x32xf32, #tpu.memory_space<vmem>>, vector<1x32xf32>
    %75 = vector.broadcast %74 : vector<1x32xf32> to vector<16x32xf32>
    %76 = arith.addf %73, %75 : vector<16x32xf32>
    %cst_45 = arith.constant 0.000000e+00 : f32
    %77 = vector.broadcast %cst_45 : f32 to vector<16x32xf32>
    %78 = arith.maximumf %76, %77 : vector<16x32xf32>
    %79 = arith.truncf %78 : vector<16x32xf32> to vector<16x32xbf16>
    %cst_46 = arith.constant 0.000000e+00 : bf16
    %80 = vector.broadcast %cst_46 : bf16 to vector<4x32xbf16>
    %81 = tpu.concatenate %80, %79, %80 in 0 : vector<4x32xbf16>, vector<16x32xbf16>, vector<4x32xbf16> -> vector<24x32xbf16>
    %cst_47 = arith.constant 0.000000e+00 : f32
    %82 = vector.broadcast %cst_47 : f32 to vector<16x32xf32>
    %83 = vector.extract_strided_slice %81 {offsets = [0, 0], sizes = [16, 32], strides = [1, 1]} : vector<24x32xbf16> to vector<16x32xbf16>
    %c0_48 = arith.constant 0 : index
    %c0_49 = arith.constant 0 : index
    %c0_50 = arith.constant 0 : index
    %84 = vector.load %arg5[%c0_48, %c0_49, %c0_50] : memref<5x32x32xf32, #tpu.memory_space<vmem>>, vector<1x32x32xf32>
    %85 = vector.shape_cast %84 : vector<1x32x32xf32> to vector<32x32xf32>
    %86 = arith.truncf %85 : vector<32x32xf32> to vector<32x32xbf16>
    %cst_51 = arith.constant dense<0.000000e+00> : vector<16x32xf32>
    %87 = tpu.matmul %83, %86, %cst_51 {dimension_numbers = #tpu.dot_dimension_numbers<[1], [0], [0], [1], [0, 0, 1, 1], [], []>} : vector<16x32xbf16>, vector<32x32xbf16>, vector<16x32xf32> -> vector<16x32xf32>
    %88 = arith.addf %82, %87 : vector<16x32xf32>
    %89 = vector.extract_strided_slice %81 {offsets = [2, 0], sizes = [16, 32], strides = [1, 1]} : vector<24x32xbf16> to vector<16x32xbf16>
    %c1_52 = arith.constant 1 : index
    %c0_53 = arith.constant 0 : index
    %c0_54 = arith.constant 0 : index
    %90 = vector.load %arg5[%c1_52, %c0_53, %c0_54] : memref<5x32x32xf32, #tpu.memory_space<vmem>>, vector<1x32x32xf32>
    %91 = vector.shape_cast %90 : vector<1x32x32xf32> to vector<32x32xf32>
    %92 = arith.truncf %91 : vector<32x32xf32> to vector<32x32xbf16>
    %cst_55 = arith.constant dense<0.000000e+00> : vector<16x32xf32>
    %93 = tpu.matmul %89, %92, %cst_55 {dimension_numbers = #tpu.dot_dimension_numbers<[1], [0], [0], [1], [0, 0, 1, 1], [], []>} : vector<16x32xbf16>, vector<32x32xbf16>, vector<16x32xf32> -> vector<16x32xf32>
    %94 = arith.addf %88, %93 : vector<16x32xf32>
    %95 = vector.extract_strided_slice %81 {offsets = [4, 0], sizes = [16, 32], strides = [1, 1]} : vector<24x32xbf16> to vector<16x32xbf16>
    %c2_56 = arith.constant 2 : index
    %c0_57 = arith.constant 0 : index
    %c0_58 = arith.constant 0 : index
    %96 = vector.load %arg5[%c2_56, %c0_57, %c0_58] : memref<5x32x32xf32, #tpu.memory_space<vmem>>, vector<1x32x32xf32>
    %97 = vector.shape_cast %96 : vector<1x32x32xf32> to vector<32x32xf32>
    %98 = arith.truncf %97 : vector<32x32xf32> to vector<32x32xbf16>
    %cst_59 = arith.constant dense<0.000000e+00> : vector<16x32xf32>
    %99 = tpu.matmul %95, %98, %cst_59 {dimension_numbers = #tpu.dot_dimension_numbers<[1], [0], [0], [1], [0, 0, 1, 1], [], []>} : vector<16x32xbf16>, vector<32x32xbf16>, vector<16x32xf32> -> vector<16x32xf32>
    %100 = arith.addf %94, %99 : vector<16x32xf32>
    %101 = vector.extract_strided_slice %81 {offsets = [6, 0], sizes = [16, 32], strides = [1, 1]} : vector<24x32xbf16> to vector<16x32xbf16>
    %c3_60 = arith.constant 3 : index
    %c0_61 = arith.constant 0 : index
    %c0_62 = arith.constant 0 : index
    %102 = vector.load %arg5[%c3_60, %c0_61, %c0_62] : memref<5x32x32xf32, #tpu.memory_space<vmem>>, vector<1x32x32xf32>
    %103 = vector.shape_cast %102 : vector<1x32x32xf32> to vector<32x32xf32>
    %104 = arith.truncf %103 : vector<32x32xf32> to vector<32x32xbf16>
    %cst_63 = arith.constant dense<0.000000e+00> : vector<16x32xf32>
    %105 = tpu.matmul %101, %104, %cst_63 {dimension_numbers = #tpu.dot_dimension_numbers<[1], [0], [0], [1], [0, 0, 1, 1], [], []>} : vector<16x32xbf16>, vector<32x32xbf16>, vector<16x32xf32> -> vector<16x32xf32>
    %106 = arith.addf %100, %105 : vector<16x32xf32>
    %107 = vector.extract_strided_slice %81 {offsets = [8, 0], sizes = [16, 32], strides = [1, 1]} : vector<24x32xbf16> to vector<16x32xbf16>
    %c4_64 = arith.constant 4 : index
    %c0_65 = arith.constant 0 : index
    %c0_66 = arith.constant 0 : index
    %108 = vector.load %arg5[%c4_64, %c0_65, %c0_66] : memref<5x32x32xf32, #tpu.memory_space<vmem>>, vector<1x32x32xf32>
    %109 = vector.shape_cast %108 : vector<1x32x32xf32> to vector<32x32xf32>
    %110 = arith.truncf %109 : vector<32x32xf32> to vector<32x32xbf16>
    %cst_67 = arith.constant dense<0.000000e+00> : vector<16x32xf32>
    %111 = tpu.matmul %107, %110, %cst_67 {dimension_numbers = #tpu.dot_dimension_numbers<[1], [0], [0], [1], [0, 0, 1, 1], [], []>} : vector<16x32xbf16>, vector<32x32xbf16>, vector<16x32xf32> -> vector<16x32xf32>
    %112 = arith.addf %106, %111 : vector<16x32xf32>
    %c0_68 = arith.constant 0 : index
    %c0_69 = arith.constant 0 : index
    %113 = vector.load %arg6[%c0_68, %c0_69] : memref<1x32xf32, #tpu.memory_space<vmem>>, vector<1x32xf32>
    %114 = vector.broadcast %113 : vector<1x32xf32> to vector<16x32xf32>
    %115 = arith.addf %112, %114 : vector<16x32xf32>
    %cst_70 = arith.constant 0.000000e+00 : f32
    %116 = vector.broadcast %cst_70 : f32 to vector<16x32xf32>
    %117 = arith.maximumf %115, %116 : vector<16x32xf32>
    %c0_71 = arith.constant 0 : index
    %c0_72 = arith.constant 0 : index
    %118 = vector.load %arg7[%c0_71, %c0_72] : memref<16x32xf32, #tpu.memory_space<vmem>>, vector<16x32xf32>
    tpu.vector_store %arg7[%c0_71, %c0_72], %117 {strides = array<i32>} : memref<16x32xf32, #tpu.memory_space<vmem>>, vector<16x32xf32>,
    return
  }
}

</mosaic_0001>

<bundles_post_ra>
// kernel: tpu_custom_call.1
= control target key start
LH: loop header
LB: loop body
LE: loop exit
PB: predicated region body
PF: predicated region fallthrough
CT: control target
= control target key end

     0   :  { %12 = vsyncpa [#allocation3], 0  ;;  %s1409_s0 = inlined_call_operand.vmem [shape: f32[16,8], index: 0, kind: input, shape index: {}]   ;;  %s1410_s1 = inlined_call_operand.hbm [shape: f32[5,8,32], index: 1, kind: input, shape index: {}]   ;;  %s1411_s2 = inlined_call_operand.vmem [shape: f32[1,32], index: 2, kind: input, shape index: {}]   ;;  %s1412_s3 = inlined_call_operand.hbm [shape: f32[5,32,32], index: 3, kind: input, shape index: {}]   ;;  %s1413_s4 = inlined_call_operand.vmem [shape: f32[1,32], index: 4, kind: input, shape index: {}]   ;;  %s1414_s5 = inlined_call_operand.hbm [shape: f32[5,32,32], index: 5, kind: input, shape index: {}]   ;;  %s1415_s6 = inlined_call_operand.vmem [shape: f32[1,32], index: 6, kind: input, shape index: {}]   ;;  %s1416_s7 = inlined_call_operand.hbm [shape: f32[16,32], index: 7, kind: output, shape index: {}]  }
   0x1   :  { %13 = vsyncpa [#allocation6], 0 }
   0x2   :  { %14 = vsyncpa [#allocation4], 0  ;;  %s1227_s24 = smov [#allocation5]   ;;  %s1228_s26 = smov [#allocation2]  }
   0x3   :  { %s36_s25 = sshll.u32 %s1227_s24, 4  ;;  %s22_s27 = sshll.u32 %s1228_s26, 4  ;;  %s37_s25 = int_to_ptr.vmem [resolvable:$true] %s36_s25  ;;  %s23_s27 = int_to_ptr.vmem [resolvable:$true] %s22_s27 }
   0x4   :  { %s1149_s28 = scalar_lea.vmem %s37_s25, 2560  ;;  %p1154_p1 = scmp.lt.s32.totalorder %s37_s25, %s37_s25 }
   0x5   :  { %p1150_p0 = scmp.ne.s32.totalorder %s37_s25, %s1149_s28  ;;  %p1155_p2 = scmp.lt.s32.totalorder %s1149_s28, %s1149_s28 }
   0x7   :  { %p1156_p3 = por %p1155_p2, %p1154_p1 }
   0x9   :  { %p1157_p4 = pnand %p1156_p3, %p1150_p0 }
   0xb   :  { %1160 = shalt.err (!%p1157_p4)
}
   0xc   :  { %s1229_s29 = smov 128   ;;  %s1230_s30 = smov 8  }
   0xd   :  { %42 = dma.hbm_to_vmem [thread:$0]  %s1412_s3, 2560, %s37_s25, [#allocation6], %s1229_s29, %s1229_s29, %s1230_s30  }
   0xe   :  { %s1169_s10 = scalar_lea.vmem %s23_s27, 640  ;;  %p1174_p6 = scmp.lt.s32.totalorder %s23_s27, %s23_s27 }
   0xf   :  { %p1170_p5 = scmp.ne.s32.totalorder %s23_s27, %s1169_s10  ;;  %p1175_p7 = scmp.lt.s32.totalorder %s1169_s10, %s1169_s10 }
  0x11   :  { %p1176_p8 = por %p1175_p7, %p1174_p6 }
  0x13   :  { %p1177_p9 = pnand %p1176_p8, %p1170_p5 }
  0x15   :  { %1180 = shalt.err (!%p1177_p9)
}
  0x16   :  { %28 = dma.hbm_to_vmem [thread:$0]  %s1410_s1, 640, %s23_s27, [#allocation3], %s1229_s29, %s1229_s29, %s1230_s30  }
  0x17   :  { %s1231_s13 = smov [#allocation7]  }
  0x18   :  { %s50_s14 = sshll.u32 %s1231_s13, 4  ;;  %s51_s14 = int_to_ptr.vmem [resolvable:$true] %s50_s14 }
  0x19   :  { %s1189_s15 = scalar_lea.vmem %s51_s14, 2560  ;;  %p1194_p11 = scmp.lt.s32.totalorder %s51_s14, %s51_s14 }
  0x1a   :  { %p1190_p10 = scmp.ne.s32.totalorder %s51_s14, %s1189_s15  ;;  %p1195_p12 = scmp.lt.s32.totalorder %s1189_s15, %s1189_s15 }
  0x1c   :  { %p1196_p13 = por %p1195_p12, %p1194_p11 }
  0x1e   :  { %p1197_p0 = pnand %p1196_p13, %p1190_p10 }
  0x20   :  { %1200 = shalt.err (!%p1197_p0)
}
  0x21   :  { %56 = dma.hbm_to_vmem [thread:$0]  %s1414_s5, 2560, %s51_s14, [#allocation6], %s1229_s29, %s1229_s29, %s1230_s30  }
  0x22   :  { %1221 = dma.done.wait [#allocation3], 640  }
  0x23   :  { %1222 = vsyncadd [#allocation3], 4294966656 }
  0x24   :  { %1223 = dma.done.wait [#allocation6], 5120  }
  0x25   :  { %1224 = vsyncadd [#allocation6], 4294962176  ;;  %v1232_v0 = vmov 0.0   ;;  %vm1233_vm0 = vmmov 0   ;;  %v82_v1 = vld [vmem:[#allocation2 + $0x8] sm:$0xff]  ;;  %vm94_vm1 = vcmask 1043456  }
  0x26   :  { %1023 = vmatprep.subr.bf16.mxu0 %v1232_v0  ;;  %1029 = vmatprep.subr.bf16.mxu1 %v1232_v0  ;;  %v79_v2 = vld [vmem:[#allocation2] sm:$0xff]  ;;  %v83_v4 = vpack.c.bf16 %v82_v1, %v82_v1  ;;  %v70_v6 = vld [vmem:[%s1409_s0 + $0x8] sm:$0xff]  ;;  %v186_v7 = vld [vmem:[#allocation2 + $0x10] sm:$0xff]  ;;  %vm74_vm2 = vcmask 1041408   ;;  %vm90_vm3 = vcmask 64512   ;;  %vm86_vm4 = vcmask 1046528  }
  0x27   :  { %1025 = vmatprep.mubr.msk.bf16.mxu0 %vm1233_vm0, %v1232_v0  ;;  %1031 = vmatprep.mubr.msk.bf16.mxu1 %vm1233_vm0, %v1232_v0  ;;  %v69_v3 = vld [vmem:[%s1409_s0] sm:$0xff]  ;;  %v80_v5 = vpack.c.bf16 %v79_v2, %v79_v2  ;;  %v242_v8 = vld [vmem:[#allocation2 + $0x18] sm:$0xff]  ;;  %v187_v14 = vpack.c.bf16 %v186_v7, %v186_v7  ;;  %vm244_vm5 = vcmask 1044480   ;;  %vm188_vm6 = vcmask 1045504   ;;  %v370_v40 = vld [vmem:[#allocation5] sm:$0xff]  ;;  %s1234_s22 = smov [#allocation8]  }
  0x28   :  { %v71_v9 = vpack.c.bf16 %v70_v6, %v69_v3  ;;  %v243_v10 = vpack.c.bf16 %v242_v8, %v242_v8  ;;  %v96_v11 = vsel %vm94_vm1, %v83_v4, 0  ;;  %v298_v24 = vld [vmem:[#allocation2 + $0x20] sm:$0xff]  ;;  %v372_v34 = vld [vmem:[#allocation5 + $0x10] sm:$0xff]  ;;  %v371_v41 = vld [vmem:[#allocation5 + $0x8] sm:$0xff]  ;;  %vm388_vm7 = vcmask 261120   ;;  %s952_s23 = sshll.u32 %s1234_s22, 4  ;;  %s953_s23 = int_to_ptr.vmem [resolvable:$true] %s952_s23 }
  0x29   :  { %v142_v12 = vsel %vm94_vm1, %v80_v5, 0  ;;  %1024 = vmatpush3.bf16.msra.mxu0 %v96_v11  ;;  %v196_v20 = vsel %vm94_vm1, %v187_v14, 0  ;;  %v299_v28 = vpack.c.bf16 %v298_v24, %v298_v24  ;;  %v373_v35 = vld [vmem:[#allocation5 + $0x18] sm:$0xff]  ;;  %v379_v37 = vld [vmem:[#allocation5 + $0x30] sm:$0xff]  ;;  %v374_v42 = vpack.c.bf16 %v371_v41, %v370_v40  ;;  %v377_v43 = vld [vmem:[#allocation5 + $0x20] sm:$0xff]  ;;  %s1201_s24 = scalar_lea.vmem %s953_s23, 256  ;;  %p1206_p2 = scmp.lt.s32.totalorder %s953_s23, %s953_s23 }
  0x2a   :  { %1030 = vmatpush3.bf16.msra.mxu1 %v142_v12  ;;  %v73_v13 = vrot.slane %v71_v9, 6  ;;  %1035 = vmatprep.subr.bf16.mxu0 %v1232_v0  ;;  %v252_v15 = vsel %vm94_vm1, %v243_v10, 0  ;;  %v375_v36 = vpack.c.bf16 %v373_v35, %v372_v34  ;;  %v380_v38 = vld [vmem:[#allocation5 + $0x38] sm:$0xff]  ;;  %v378_v44 = vld [vmem:[#allocation5 + $0x28] sm:$0xff]  ;;  %p1202_p1 = scmp.ne.s32.totalorder %s953_s23, %s1201_s24  ;;  %p1207_p3 = scmp.lt.s32.totalorder %s1201_s24, %s1201_s24 }
  0x2b   :  { %1041 = vmatprep.subr.bf16.mxu1 %v1232_v0  ;;  %v308_v30 = vsel %vm94_vm1, %v299_v28, 0  ;;  %v382_v39 = vpack.c.bf16 %v380_v38, %v379_v37  ;;  %v381_v45 = vpack.c.bf16 %v378_v44, %v377_v43  ;;  %v970_v6 = vld [vmem:[%s1411_s2] ss:$0 sm:$0xff]  ;;  %v534_v24 = vld [vmem:[#allocation5 + $0x68] sm:$0xff]  ;;  %v591_v37 = vld [vmem:[#allocation5 + $0x90] sm:$0xff] }
  0x2c   :  { %v77_v16 = vsel %vm74_vm2, 0, %v73_v13  ;;  %v78_v17 = vsel %vm74_vm2, %v73_v13, 0  ;;  %v592_v38 = vld [vmem:[#allocation5 + $0x98] sm:$0xff]  ;;  %v589_v43 = vld [vmem:[#allocation5 + $0x80] sm:$0xff]  ;;  %v590_v44 = vld [vmem:[#allocation5 + $0x88] sm:$0xff]  ;;  %p1208_p4 = por %p1207_p3, %p1206_p2 }
  0x2d   :  { %v87_v18 = vrot.slane %v77_v16, 1  ;;  %v88_v19 = vrot.slane %v78_v17, 1  ;;  %1032 = vmatmul.mubr.msk.bf16.vlgmr.msra.gmra.mxu1 %vm90_vm3, %v77_v16  ;;  %v245_v21 = vrot.slane %v77_v16, 3  ;;  %v246_v22 = vrot.slane %v78_v17, 3 }
  0x2e   :  { %1042 = vmatpush3.bf16.msra.mxu1 %v252_v15  ;;  %1043 = vmatprep.mubr.msk.bf16.mxu1 %vm1233_vm0, %v1232_v0  ;;  %v189_v25 = vrot.slane %v77_v16, 2  ;;  %v190_v26 = vrot.slane %v78_v17, 2  ;;  %v301_v31 = vrot.slane %v77_v16, 4  ;;  %v302_v32 = vrot.slane %v78_v17, 4  ;;  %v535_v16 = vld [vmem:[#allocation5 + $0x70] sm:$0xff]  ;;  %v536_v17 = vld [vmem:[#allocation5 + $0x78] sm:$0xff]  ;;  %p1209_p5 = pnand %p1208_p4, %p1202_p1 }
  0x2f   :  { %v89_v23 = vsel %vm86_vm4, %v87_v18, %v88_v19  ;;  %1053 = vmatprep.subr.bf16.mxu1 %v1232_v0  ;;  %v247_v27 = vsel %vm244_vm5, %v245_v21, %v246_v22  ;;  %v479_v21 = vld [vmem:[#allocation5 + $0x50] sm:$0xff]  ;;  %v480_v22 = vld [vmem:[#allocation5 + $0x58] sm:$0xff] }
  0x30   :  { %1026 = vmatmul.mubr.msk.bf16.vlgmr.msra.gmra.mxu0 %vm90_vm3, %v89_v23  ;;  %v191_v29 = vsel %vm188_vm6, %v189_v25, %v190_v26  ;;  %v303_v33 = vsel %vm94_vm1, %v301_v31, %v302_v32  ;;  %v533_v23 = vld [vmem:[#allocation5 + $0x60] sm:$0xff]  ;;  %v478_v32 = vld [vmem:[#allocation5 + $0x48] sm:$0xff] }
  0x31   :  { %1036 = vmatpush3.bf16.msra.mxu0 %v196_v20  ;;  %1037 = vmatprep.mubr.msk.bf16.mxu0 %vm1233_vm0, %v1232_v0  ;;  %v538_v20 = vpack.c.bf16 %v536_v17, %v535_v16  ;;  %v477_v31 = vld [vmem:[#allocation5 + $0x40] sm:$0xff] }
  0x32   :  { %1047 = vmatprep.subr.bf16.mxu0 %v1232_v0 }
  0x35   :  { %1044 = vmatmul.mubr.msk.bf16.vlgmr.msra.gmra.mxu1 %vm90_vm3, %v247_v27 }
  0x36   :  { %1057 = vmatprep.mubr.msk.bf16.mxu1 %vm1233_vm0, %v1232_v0  ;;  %1054 = vmatpush3.bf16.msra.mxu1 %v382_v39 }
  0x37   :  { %1055 = vmatprep.subr.bf16.mxu1 %v1232_v0 }
  0x38   :  { %1038 = vmatmul.mubr.msk.bf16.vlgmr.msra.gmra.mxu0 %vm90_vm3, %v191_v29  ;;  %v482_v29 = vpack.c.bf16 %v480_v22, %v479_v21  ;;  %v976_v22 = vld [vmem:[%s1413_s4] ss:$0 sm:$0xff] }
  0x39   :  { %1048 = vmatpush3.bf16.msra.mxu0 %v308_v30  ;;  %1049 = vmatprep.mubr.msk.bf16.mxu0 %vm1233_vm0, %v1232_v0  ;;  %v537_v30 = vpack.c.bf16 %v534_v24, %v533_v23 }
  0x3a   :  { %1061 = vmatprep.subr.bf16.mxu0 %v1232_v0  ;;  %1056 = vmatpush3.bf16.msra.mxu1 %v381_v45 }
  0x3b   :  { %1069 = vmatprep.subr.bf16.mxu1 %v1232_v0 }
  0x40   :  { %1050 = vmatmul.mubr.msk.bf16.vlgmr.msra.gmra.mxu0 %vm90_vm3, %v303_v33 }
  0x41   :  { %1065 = vmatprep.mubr.msk.bf16.mxu0 %vm1233_vm0, %v1232_v0  ;;  %1062 = vmatpush3.bf16.msra.mxu0 %v375_v36  ;;  %v481_v36 = vpack.c.bf16 %v478_v32, %v477_v31  ;;  %v825_v32 = vld [vmem:[#allocation7 + $0x70] sm:$0xff] }
  0x42   :  { %1063 = vmatprep.subr.bf16.mxu0 %v1232_v0 }
  0x45   :  { %1064 = vmatpush3.bf16.msra.mxu0 %v374_v42  ;;  %v594_v42 = vpack.c.bf16 %v592_v38, %v591_v37  ;;  %v769_v37 = vld [vmem:[#allocation7 + $0x50] sm:$0xff]  ;;  %v770_v38 = vld [vmem:[#allocation7 + $0x58] sm:$0xff] }
  0x46   :  { %1077 = vmatprep.subr.bf16.mxu0 %v1232_v0 }
  0xed   :  { %v178_v46 = vpop.f32.mrf.mxu1 }
  0xef   :  { %v1033_v47 = vpop.f32.mrf.mxu1 }
  0xf0   :  { %v132_v48 = vpop.f32.mrf.mxu0 }
  0xf1   :  { %v181_v49 = vpop.f32.mrf.mxu1  ;;  %v179_v57 = vadd.f32 %v178_v46, %v132_v48  ;;  %v593_v46 = vpack.c.bf16 %v590_v44, %v589_v43 }
  0xf2   :  { %v1027_v50 = vpop.f32.mrf.mxu0 }
  0xf3   :  { %v1034_v51 = vpop.f32.mrf.mxu1  ;;  %v663_v50 = vld [vmem:[#allocation7 + $0x10] sm:$0xff] }
  0xf4   :  { %v135_v52 = vpop.f32.mrf.mxu0  ;;  %v664_v51 = vld [vmem:[#allocation7 + $0x18] sm:$0xff] }
  0xf5   :  { %v288_v53 = vpop.f32.mrf.mxu1  ;;  %v182_v63 = vadd.f32 %v181_v49, %v135_v52  ;;  %v666_v52 = vpack.c.bf16 %v664_v51, %v663_v50 }
  0xf6   :  { %v1028_v54 = vpop.f32.mrf.mxu0 }
  0xf7   :  { %v1045_v55 = vpop.f32.mrf.mxu1  ;;  %v671_v54 = vld [vmem:[#allocation7 + $0x38] sm:$0xff] }
  0xf8   :  { %v232_v56 = vpop.f32.mrf.mxu0 }
  0xf9   :  { %v291_v58 = vpop.f32.mrf.mxu1  ;;  %v239_v60 = vadd.f32 %v232_v56, %v179_v57  ;;  %v661_v56 = vld [vmem:[#allocation7] sm:$0xff]  ;;  %v662_v57 = vld [vmem:[#allocation7 + $0x8] sm:$0xff] }
  0xfa   :  { %v1039_v59 = vpop.f32.mrf.mxu0 }
  0xfb   :  { %v1046_v61 = vpop.f32.mrf.mxu1  ;;  %v295_v2 = vadd.f32 %v288_v53, %v239_v60  ;;  %v670_v53 = vld [vmem:[#allocation7 + $0x30] sm:$0xff]  ;;  %v668_v59 = vld [vmem:[#allocation7 + $0x20] sm:$0xff]  ;;  %v669_v60 = vld [vmem:[#allocation7 + $0x28] sm:$0xff] }
  0xfc   :  { %v235_v62 = vpop.f32.mrf.mxu0  ;;  %v673_v55 = vpack.c.bf16 %v671_v54, %v670_v53  ;;  %v672_v61 = vpack.c.bf16 %v669_v60, %v668_v59  ;;  %v881_v53 = vld [vmem:[#allocation7 + $0x90] sm:$0xff]  ;;  %v882_v54 = vld [vmem:[#allocation7 + $0x98] sm:$0xff]  ;;  %v879_v59 = vld [vmem:[#allocation7 + $0x80] sm:$0xff] }
  0xfd   :  { %v240_v3 = vadd.f32 %v235_v62, %v182_v63  ;;  %v880_v60 = vld [vmem:[#allocation7 + $0x88] sm:$0xff] }
  0xfe   :  { %v1040_v1 = vpop.f32.mrf.mxu0 }
  0xff   :  { %v296_v8 = vadd.f32 %v291_v58, %v240_v3  ;;  %v665_v58 = vpack.c.bf16 %v662_v57, %v661_v56 }
 0x100   :  { %v344_v4 = vpop.f32.mrf.mxu0 }
 0x101   :  { %v351_v5 = vadd.f32 %v344_v4, %v295_v2 }
 0x102   :  { %v1051_v7 = vpop.f32.mrf.mxu0 }
 0x103   :  { %v360_v10 = vadd.f32 %v970_v6, %v351_v5 }
 0x104   :  { %v347_v9 = vpop.f32.mrf.mxu0 }
 0x105   :  { %v352_v11 = vadd.f32 %v347_v9, %v296_v8  ;;  %v362_v14 = vmax.f32 %v360_v10, 0.0 }
 0x106   :  { %v1052_v12 = vpop.f32.mrf.mxu0 }
 0x107   :  { %v361_v13 = vadd.f32 %v970_v6, %v352_v11 }
 0x109   :  { %v363_v15 = vmax.f32 %v361_v13, 0.0 }
 0x10b   :  { %v364_v18 = vpack.c.bf16 %v363_v15, %v362_v14 }
 0x10d   :  { %v366_v19 = vrot.slane %v364_v18, 6 }
 0x10f   :  { %v369_v25 = vsel %vm74_vm2, %v366_v19, 0  ;;  %v368_v26 = vsel %vm74_vm2, 0, %v366_v19 }
 0x110   :  { %1066 = vmatmul.mubr.msk.bf16.vlgmr.msra.gmra.mxu0 %vm388_vm7, %v368_v26  ;;  %v385_v27 = vrot.slane %v368_v26, 1  ;;  %v386_v28 = vrot.slane %v369_v25, 1  ;;  %v539_v34 = vrot.slane %v368_v26, 3  ;;  %v540_v35 = vrot.slane %v369_v25, 3 }
 0x111   :  { %1078 = vmatpush3.bf16.msra.mxu0 %v538_v20  ;;  %1081 = vmatprep.mubr.msk.bf16.mxu0 %vm1233_vm0, %v1232_v0  ;;  %v483_v39 = vrot.slane %v368_v26, 2  ;;  %v484_v40 = vrot.slane %v369_v25, 2  ;;  %v595_v47 = vrot.slane %v368_v26, 4  ;;  %v596_v48 = vrot.slane %v369_v25, 4 }
 0x112   :  { %v387_v33 = vsel %vm86_vm4, %v385_v27, %v386_v28  ;;  %1079 = vmatprep.subr.bf16.mxu0 %v1232_v0  ;;  %v541_v41 = vsel %vm244_vm5, %v539_v34, %v540_v35 }
 0x113   :  { %1058 = vmatmul.mubr.msk.bf16.vlgmr.msra.gmra.mxu1 %vm388_vm7, %v387_v33  ;;  %v485_v45 = vsel %vm188_vm6, %v483_v39, %v484_v40  ;;  %v597_v49 = vsel %vm94_vm1, %v595_v47, %v596_v48  ;;  %v826_v33 = vld [vmem:[#allocation7 + $0x78] sm:$0xff]  ;;  %v823_v39 = vld [vmem:[#allocation7 + $0x60] sm:$0xff]  ;;  %v824_v40 = vld [vmem:[#allocation7 + $0x68] sm:$0xff] }
 0x114   :  { %1070 = vmatpush3.bf16.msra.mxu1 %v482_v29  ;;  %1073 = vmatprep.mubr.msk.bf16.mxu1 %vm1233_vm0, %v1232_v0  ;;  %v767_v47 = vld [vmem:[#allocation7 + $0x40] sm:$0xff]  ;;  %v768_v48 = vld [vmem:[#allocation7 + $0x48] sm:$0xff] }
 0x115   :  { %1080 = vmatpush3.bf16.msra.mxu0 %v537_v30  ;;  %1071 = vmatprep.subr.bf16.mxu1 %v1232_v0 }
 0x116   :  { %1093 = vmatprep.subr.bf16.mxu0 %v1232_v0 }
 0x118   :  { %1072 = vmatpush3.bf16.msra.mxu1 %v481_v36  ;;  %1082 = vmatmul.mubr.msk.bf16.vlgmr.msra.gmra.mxu0 %vm388_vm7, %v541_v41  ;;  %v828_v36 = vpack.c.bf16 %v826_v33, %v825_v32 }
 0x119   :  { %1085 = vmatprep.subr.bf16.mxu1 %v1232_v0  ;;  %1097 = vmatprep.mubr.msk.bf16.mxu0 %vm1233_vm0, %v1232_v0 }
 0x11a   :  { %1094 = vmatpush3.bf16.msra.mxu0 %v673_v55 }
 0x11b   :  { %1074 = vmatmul.mubr.msk.bf16.vlgmr.msra.gmra.mxu1 %vm388_vm7, %v485_v45  ;;  %1095 = vmatprep.subr.bf16.mxu0 %v1232_v0  ;;  %v772_v45 = vpack.c.bf16 %v770_v38, %v769_v37 }
 0x11c   :  { %1086 = vmatpush3.bf16.msra.mxu1 %v594_v42  ;;  %1089 = vmatprep.mubr.msk.bf16.mxu1 %vm1233_vm0, %v1232_v0 }
 0x11d   :  { %1087 = vmatprep.subr.bf16.mxu1 %v1232_v0 }
 0x11e   :  { %1096 = vmatpush3.bf16.msra.mxu0 %v672_v61 }
 0x11f   :  { %1109 = vmatprep.subr.bf16.mxu0 %v1232_v0 }
 0x120   :  { %1088 = vmatpush3.bf16.msra.mxu1 %v593_v46  ;;  %v827_v46 = vpack.c.bf16 %v824_v40, %v823_v39 }
 0x121   :  { %1101 = vmatprep.subr.bf16.mxu1 %v1232_v0 }
 0x123   :  { %1090 = vmatmul.mubr.msk.bf16.vlgmr.msra.gmra.mxu1 %vm388_vm7, %v597_v49 }
 0x124   :  { %1105 = vmatprep.mubr.msk.bf16.mxu1 %vm1233_vm0, %v1232_v0  ;;  %1102 = vmatpush3.bf16.msra.mxu1 %v666_v52  ;;  %v771_v52 = vpack.c.bf16 %v768_v48, %v767_v47 }
 0x125   :  { %1103 = vmatprep.subr.bf16.mxu1 %v1232_v0 }
 0x128   :  { %1104 = vmatpush3.bf16.msra.mxu1 %v665_v58  ;;  %v884_v58 = vpack.c.bf16 %v882_v54, %v881_v53 }
 0x129   :  { %1117 = vmatprep.subr.bf16.mxu1 %v1232_v0 }
 0x1d0   :  { %v469_v62 = vpop.f32.mrf.mxu0 }
 0x1d2   :  { %v1067_v63 = vpop.f32.mrf.mxu0 }
 0x1d3   :  { %v426_v1 = vpop.f32.mrf.mxu1 }
 0x1d4   :  { %v472_v2 = vpop.f32.mrf.mxu0  ;;  %v470_v10 = vadd.f32 %v469_v62, %v426_v1  ;;  %v883_v62 = vpack.c.bf16 %v880_v60, %v879_v59 }
 0x1d5   :  { %v1059_v3 = vpop.f32.mrf.mxu1 }
 0x1d6   :  { %v1068_v4 = vpop.f32.mrf.mxu0 }
 0x1d7   :  { %v429_v5 = vpop.f32.mrf.mxu1 }
 0x1d8   :  { %v579_v6 = vpop.f32.mrf.mxu0  ;;  %v473_v16 = vadd.f32 %v472_v2, %v429_v5 }
 0x1d9   :  { %v1060_v7 = vpop.f32.mrf.mxu1 }
 0x1da   :  { %v1083_v8 = vpop.f32.mrf.mxu0 }
 0x1db   :  { %v523_v9 = vpop.f32.mrf.mxu1 }
 0x1dc   :  { %v582_v11 = vpop.f32.mrf.mxu0  ;;  %v530_v13 = vadd.f32 %v523_v9, %v470_v10 }
 0x1dd   :  { %v1075_v12 = vpop.f32.mrf.mxu1 }
 0x1de   :  { %v1084_v14 = vpop.f32.mrf.mxu0  ;;  %v586_v19 = vadd.f32 %v579_v6, %v530_v13 }
 0x1df   :  { %v526_v15 = vpop.f32.mrf.mxu1 }
 0x1e0   :  { %v531_v18 = vadd.f32 %v526_v15, %v473_v16 }
 0x1e1   :  { %v1076_v17 = vpop.f32.mrf.mxu1 }
 0x1e2   :  { %v587_v24 = vadd.f32 %v582_v11, %v531_v18 }
 0x1e3   :  { %v635_v20 = vpop.f32.mrf.mxu1 }
 0x1e4   :  { %v642_v21 = vadd.f32 %v635_v20, %v586_v19 }
 0x1e5   :  { %v1091_v23 = vpop.f32.mrf.mxu1 }
 0x1e6   :  { %v651_v26 = vadd.f32 %v976_v22, %v642_v21 }
 0x1e7   :  { %v638_v25 = vpop.f32.mrf.mxu1 }
 0x1e8   :  { %v643_v27 = vadd.f32 %v638_v25, %v587_v24  ;;  %v653_v30 = vmax.f32 %v651_v26, 0.0  ;;  %v982_v24 = vld [vmem:[%s1415_s6] ss:$0 sm:$0xff] }
 0x1e9   :  { %v1092_v28 = vpop.f32.mrf.mxu1 }
 0x1ea   :  { %v652_v29 = vadd.f32 %v976_v22, %v643_v27 }
 0x1ec   :  { %v654_v31 = vmax.f32 %v652_v29, 0.0 }
 0x1ee   :  { %v655_v34 = vpack.c.bf16 %v654_v31, %v653_v30 }
 0x1f0   :  { %v657_v35 = vrot.slane %v655_v34, 6 }
 0x1f2   :  { %v660_v41 = vsel %vm74_vm2, %v657_v35, 0  ;;  %v659_v42 = vsel %vm74_vm2, 0, %v657_v35 }
 0x1f3   :  { %1106 = vmatmul.mubr.msk.bf16.vlgmr.msra.gmra.mxu1 %vm388_vm7, %v659_v42  ;;  %v676_v43 = vrot.slane %v659_v42, 1  ;;  %v677_v44 = vrot.slane %v660_v41, 1  ;;  %v829_v50 = vrot.slane %v659_v42, 3  ;;  %v830_v51 = vrot.slane %v660_v41, 3 }
 0x1f4   :  { %1118 = vmatpush3.bf16.msra.mxu1 %v828_v36  ;;  %1121 = vmatprep.mubr.msk.bf16.mxu1 %vm1233_vm0, %v1232_v0  ;;  %v773_v55 = vrot.slane %v659_v42, 2  ;;  %v774_v56 = vrot.slane %v660_v41, 2  ;;  %v885_v63 = vrot.slane %v659_v42, 4  ;;  %v886_v1 = vrot.slane %v660_v41, 4 }
 0x1f5   :  { %v678_v49 = vsel %vm86_vm4, %v676_v43, %v677_v44  ;;  %1119 = vmatprep.subr.bf16.mxu1 %v1232_v0  ;;  %v831_v57 = vsel %vm244_vm5, %v829_v50, %v830_v51 }
 0x1f6   :  { %1098 = vmatmul.mubr.msk.bf16.vlgmr.msra.gmra.mxu0 %vm388_vm7, %v678_v49  ;;  %v775_v61 = vsel %vm188_vm6, %v773_v55, %v774_v56  ;;  %v887_v2 = vsel %vm94_vm1, %v885_v63, %v886_v1 }
 0x1f7   :  { %1110 = vmatpush3.bf16.msra.mxu0 %v772_v45  ;;  %1113 = vmatprep.mubr.msk.bf16.mxu0 %vm1233_vm0, %v1232_v0 }
 0x1f8   :  { %1120 = vmatpush3.bf16.msra.mxu1 %v827_v46  ;;  %1111 = vmatprep.subr.bf16.mxu0 %v1232_v0 }
 0x1fb   :  { %1112 = vmatpush3.bf16.msra.mxu0 %v771_v52  ;;  %1122 = vmatmul.mubr.msk.bf16.vlgmr.msra.gmra.mxu1 %vm388_vm7, %v831_v57 }
 0x1fc   :  { %1125 = vmatprep.subr.bf16.mxu0 %v1232_v0 }
 0x1fe   :  { %1114 = vmatmul.mubr.msk.bf16.vlgmr.msra.gmra.mxu0 %vm388_vm7, %v775_v61 }
 0x1ff   :  { %1126 = vmatpush3.bf16.msra.mxu0 %v884_v58  ;;  %1129 = vmatprep.mubr.msk.bf16.mxu0 %vm1233_vm0, %v1232_v0 }
 0x200   :  { %1127 = vmatprep.subr.bf16.mxu0 %v1232_v0 }
 0x203   :  { %1128 = vmatpush3.bf16.msra.mxu0 %v883_v62 }
 0x206   :  { %1130 = vmatmul.mubr.msk.bf16.vlgmr.msra.gmra.mxu0 %vm388_vm7, %v887_v2 }
 0x2b3   :  { %v759_v3 = vpop.f32.mrf.mxu1 }
 0x2b5   :  { %v1107_v4 = vpop.f32.mrf.mxu1 }
 0x2b6   :  { %v716_v5 = vpop.f32.mrf.mxu0 }
 0x2b7   :  { %v762_v6 = vpop.f32.mrf.mxu1  ;;  %v760_v14 = vadd.f32 %v759_v3, %v716_v5 }
 0x2b8   :  { %v1099_v7 = vpop.f32.mrf.mxu0 }
 0x2b9   :  { %v1108_v8 = vpop.f32.mrf.mxu1 }
 0x2ba   :  { %v719_v9 = vpop.f32.mrf.mxu0 }
 0x2bb   :  { %v869_v10 = vpop.f32.mrf.mxu1  ;;  %v763_v19 = vadd.f32 %v762_v6, %v719_v9 }
 0x2bc   :  { %v1100_v11 = vpop.f32.mrf.mxu0 }
 0x2bd   :  { %v1123_v12 = vpop.f32.mrf.mxu1 }
 0x2be   :  { %v813_v13 = vpop.f32.mrf.mxu0 }
 0x2bf   :  { %v872_v0 = vpop.f32.mrf.mxu1  ;;  %v820_v16 = vadd.f32 %v813_v13, %v760_v14 }
 0x2c0   :  { %v1115_v15 = vpop.f32.mrf.mxu0 }
 0x2c1   :  { %v1124_v17 = vpop.f32.mrf.mxu1  ;;  %v876_v22 = vadd.f32 %v869_v10, %v820_v16 }
 0x2c2   :  { %v816_v18 = vpop.f32.mrf.mxu0 }
 0x2c3   :  { %v821_v21 = vadd.f32 %v816_v18, %v763_v19 }
 0x2c4   :  { %v1116_v20 = vpop.f32.mrf.mxu0 }
 0x2c5   :  { %v877_v28 = vadd.f32 %v872_v0, %v821_v21 }
 0x2c6   :  { %v925_v23 = vpop.f32.mrf.mxu0 }
 0x2c7   :  { %v932_v25 = vadd.f32 %v925_v23, %v876_v22 }
 0x2c8   :  { %v1131_v26 = vpop.f32.mrf.mxu0 }
 0x2c9   :  { %v941_v27 = vadd.f32 %v982_v24, %v932_v25 }
 0x2ca   :  { %v928_v29 = vpop.f32.mrf.mxu0 }
 0x2cb   :  { %v943_v30 = vmax.f32 %v941_v27, 0.0  ;;  %v933_v31 = vadd.f32 %v928_v29, %v877_v28 }
 0x2cc   :  { %v1132_v32 = vpop.f32.mrf.mxu0 }
 0x2cd   :  { %945 = vst.msk [vmem:[#allocation8] sm:$0xff] %vm388_vm7, %v943_v30  ;;  %v942_v33 = vadd.f32 %v982_v24, %v933_v31 }
 0x2cf   :  { %v944_v34 = vmax.f32 %v942_v33, 0.0 }
 0x2d1   :  { %946 = vst.msk [vmem:[#allocation8 + $0x8] sm:$0xff] %vm388_vm7, %v944_v34 }
 0x2d2   :  { %1212 = shalt.err (!%p1209_p5)
}
 0x2d3   :  { %958 = dma.vmem_to_hbm [thread:$0]  %s953_s23, 256, %s1416_s7, [#allocation4], %s1229_s29, %s1229_s29, %s1230_s30  }
 0x2d4   :  { %1225 = dma.done.wait [#allocation4], 256  }
 0x2d5   :  { %1226 = vsyncadd [#allocation4], 4294967040 }
 0x2d6   :  { %962 = vsyncpa [#allocation3], 1 }
 0x2d7   :  { %963 = vsyncpa [#allocation6], 1 }
 0x2d8   :  { %964 = vsyncpa [#allocation4], 1 }

</bundles_post_ra>
